<compile_context>
chip_gen: v7x
topology: tpu7x:2x2x1
jax: 0.10.0
libtpu: 0.0.40
codegen_flags: <defaults>
</compile_context>

<pallas_src>
import math

import jax
import jax.numpy as jnp
from jax.experimental import pallas as pl
from jax.experimental.pallas import tpu as pltpu

LANES = 128            # lane width (last dim of every block)
MAX_BLOCK_ROWS = 1024  # rows per block: 1024*128*4 B = 512 KiB per input block

_LN2 = math.log(2.0)


def _bce_kernel(x_ref, y_ref, out_ref):
    """One (tm, 128) tile of stable BCE-with-logits, folded into the resident
    (8, 128) output accumulator (same output block across the reduction axis)."""
    i = pl.program_id(1)

    @pl.when(i == 0)
    def _():
        out_ref[...] = jnp.zeros_like(out_ref)

    x = x_ref[...]
    y = y_ref[...]
    # Numerically stable BCEWithLogits (same formulation PyTorch uses):
    #   loss = max(x, 0) - x*y + log1p(exp(-|x|))
    term = jnp.maximum(x, 0.0) - x * y + jnp.log1p(jnp.exp(-jnp.abs(x)))

    # Fold (tm, 128) -> (8, 128) with sublane-partial sums (pure VPU adds); the
    # single full cross-lane reduce happens once, outside the kernel.
    tm = term.shape[0]
    out_ref[...] += jnp.sum(term.reshape(tm // 8, 8, LANES), axis=0)


def bce_loss_2d(logits, labels):
    """Equivalent to BCELoss2D.forward: BCEWithLogitsLoss(mean) on flattened inputs."""
    x = jnp.ravel(logits).astype(jnp.float32)
    y = jnp.ravel(labels).astype(jnp.float32)
    n_total = x.shape[0]

    # Tile geometry: last dim = 128 lanes; rows tiled by tm (multiple of 8).
    rows_needed = pl.cdiv(n_total, LANES)
    tm = min(MAX_BLOCK_ROWS, ((rows_needed + 7) // 8) * 8)
    nblocks = pl.cdiv(rows_needed, tm)

    # Split the row-block range across two cores (v7x megacore); on single-TC
    # chips the leading "parallel" axis just runs sequentially and is harmless.
    num_splits = 2 if nblocks >= 2 else 1
    nblocks = ((nblocks + num_splits - 1) // num_splits) * num_splits
    blocks_per_split = nblocks // num_splits

    rows = nblocks * tm
    n_pad = rows * LANES - n_total

    # Only materialize padded copies when strictly necessary.  Zero-padded
    # elements (x=0, y=0) each contribute exactly ln(2) to the sum, which is
    # subtracted analytically below — so no mask array is ever streamed.
    if n_pad:
        x = jnp.pad(x, (0, n_pad))
        y = jnp.pad(y, (0, n_pad))
    x2 = x.reshape(rows, LANES)
    y2 = y.reshape(rows, LANES)

    in_map = lambda c, i: (c * blocks_per_split + i, 0)

    partial = pl.pallas_call(
        _bce_kernel,
        out_shape=jax.ShapeDtypeStruct((num_splits * 8, LANES), jnp.float32),
        grid_spec=pltpu.PrefetchScalarGridSpec(
            num_scalar_prefetch=0,
            grid=(num_splits, blocks_per_split),
            in_specs=[
                pl.BlockSpec((tm, LANES), in_map),
                pl.BlockSpec((tm, LANES), in_map),
            ],
            out_specs=pl.BlockSpec((8, LANES), lambda c, i: (c, 0)),
        ),
        compiler_params=pltpu.CompilerParams(
            dimension_semantics=("parallel", "arbitrary"),
        ),
    )(x2, y2)

    total = jnp.sum(partial) - jnp.float32(n_pad) * jnp.float32(_LN2)
    return total / jnp.float32(n_total)


def _reference(logits, labels):
    x = jnp.ravel(logits).astype(jnp.float32)
    y = jnp.ravel(labels).astype(jnp.float32)
    return jnp.mean(jnp.maximum(x, 0.0) - x * y + jnp.log1p(jnp.exp(-jnp.abs(x))))


if __name__ == "__main__":
    key = jax.random.PRNGKey(0)
    k1, k2, k3, k4 = jax.random.split(key, 4)

    # Small NCHW shapes consistent with a 2D segmentation loss.
    logits = jax.random.normal(k1, (2, 4, 16, 16), dtype=jnp.float32)
    labels = (jax.random.uniform(k2, (2, 4, 16, 16)) > 0.5).astype(jnp.float32)

    loss = bce_loss_2d(logits, labels)
    jax.block_until_ready(loss)
    ref = _reference(logits, labels)
    assert jnp.allclose(loss, ref, rtol=1e-5, atol=1e-5), (loss, ref)

    # A second, ragged shape exercising the pad-free math + analytic ln(2) path.
    logits2 = jax.random.normal(k3, (2, 3, 37, 29), dtype=jnp.float32)
    labels2 = (jax.random.uniform(k4, (2, 3, 37, 29)) > 0.5).astype(jnp.float32)
    loss2 = bce_loss_2d(logits2, labels2)
    jax.block_until_ready(loss2)
    ref2 = _reference(logits2, labels2)
    assert jnp.allclose(loss2, ref2, rtol=1e-5, atol=1e-5), (loss2, ref2)

    print("KERNEL_OK")
</pallas_src>

<mosaic_0001>
module attributes {stable_mosaic.version = 11 : i64} {
  func.func @_bce_kernel(%arg0: i32, %arg1: i32, %arg2: memref<16x128xf32, #tpu.memory_space<vmem>>, %arg3: memref<16x128xf32, #tpu.memory_space<vmem>>, %arg4: memref<8x128xf32, #tpu.memory_space<vmem>>) attributes {dimension_semantics = [#tpu.dimension_semantics<parallel>, #tpu.dimension_semantics<arbitrary>], iteration_bounds = array<i64: 1, 1>, scalar_prefetch = 0 : i64, scratch_operands = 0 : i64, tpu.core_type = #tpu.core_type<tc>, window_params = [{transform_indices = @transform_0, window_bounds = array<i64: 16, 128>}, {transform_indices = @transform_1, window_bounds = array<i64: 16, 128>}, {transform_indices = @transform_2, window_bounds = array<i64: 8, 128>}]} {
    %c0_i32 = arith.constant 0 : i32
    %0 = arith.cmpi eq, %arg1, %c0_i32 : i32
    %1 = arith.extui %0 : i1 to i32
    %c0_i32_0 = arith.constant 0 : i32
    %2 = arith.cmpi ne, %1, %c0_i32_0 : i32
    scf.if %2 {
      %cst_10 = arith.constant 0.000000e+00 : f32
      %20 = vector.broadcast %cst_10 : f32 to vector<8x128xf32>
      %c0_11 = arith.constant 0 : index
      %c0_12 = arith.constant 0 : index
      %21 = vector.load %arg4[%c0_11, %c0_12] : memref<8x128xf32, #tpu.memory_space<vmem>>, vector<8x128xf32>
      tpu.vector_store %arg4[%c0_11, %c0_12], %20 {strides = array<i32>} : memref<8x128xf32, #tpu.memory_space<vmem>>, vector<8x128xf32>,
    } else {
    }
    %c0 = arith.constant 0 : index
    %c0_1 = arith.constant 0 : index
    %3 = vector.load %arg2[%c0, %c0_1] : memref<16x128xf32, #tpu.memory_space<vmem>>, vector<16x128xf32>
    %c0_2 = arith.constant 0 : index
    %c0_3 = arith.constant 0 : index
    %4 = vector.load %arg3[%c0_2, %c0_3] : memref<16x128xf32, #tpu.memory_space<vmem>>, vector<16x128xf32>
    %cst = arith.constant 0.000000e+00 : f32
    %5 = vector.broadcast %cst : f32 to vector<16x128xf32>
    %6 = arith.maximumf %3, %5 : vector<16x128xf32>
    %7 = arith.mulf %3, %4 : vector<16x128xf32>
    %8 = arith.subf %6, %7 : vector<16x128xf32>
    %9 = math.absf %3 : vector<16x128xf32>
    %cst_4 = arith.constant 0.000000e+00 : f32
    %10 = vector.broadcast %cst_4 : f32 to vector<16x128xf32>
    %11 = arith.subf %10, %9 : vector<16x128xf32>
    %12 = math.exp %11 : vector<16x128xf32>
    %13 = math.log1p %12 : vector<16x128xf32>
    %14 = arith.addf %8, %13 : vector<16x128xf32>
    %c0_5 = arith.constant 0 : index
    %c0_6 = arith.constant 0 : index
    %15 = vector.load %arg4[%c0_5, %c0_6] : memref<8x128xf32, #tpu.memory_space<vmem>>, vector<8x128xf32>
    %16 = vector.shape_cast %14 : vector<16x128xf32> to vector<2x8x128xf32>
    %cst_7 = arith.constant dense<0.000000e+00> : vector<8x128xf32>
    %17 = vector.multi_reduction <add>, %16, %cst_7 [0] : vector<2x8x128xf32> to vector<8x128xf32>
    %18 = arith.addf %15, %17 : vector<8x128xf32>
    %c0_8 = arith.constant 0 : index
    %c0_9 = arith.constant 0 : index
    %19 = vector.load %arg4[%c0_8, %c0_9] : memref<8x128xf32, #tpu.memory_space<vmem>>, vector<8x128xf32>
    tpu.vector_store %arg4[%c0_8, %c0_9], %18 {strides = array<i32>} : memref<8x128xf32, #tpu.memory_space<vmem>>, vector<8x128xf32>,
    return
  }
  func.func @transform_0(%arg0: i32, %arg1: i32) -> (i32, i32) {
    %c1_i32 = arith.constant 1 : i32
    %0 = arith.muli %arg0, %c1_i32 : i32
    %1 = arith.addi %0, %arg1 : i32
    %c0_i32 = arith.constant 0 : i32
    %c0_i32_0 = arith.constant 0 : i32
    return %1, %c0_i32 : i32, i32
  }
  func.func @transform_1(%arg0: i32, %arg1: i32) -> (i32, i32) {
    %c1_i32 = arith.constant 1 : i32
    %0 = arith.muli %arg0, %c1_i32 : i32
    %1 = arith.addi %0, %arg1 : i32
    %c0_i32 = arith.constant 0 : i32
    %c0_i32_0 = arith.constant 0 : i32
    return %1, %c0_i32 : i32, i32
  }
  func.func @transform_2(%arg0: i32, %arg1: i32) -> (i32, i32) {
    %c0_i32 = arith.constant 0 : i32
    %c0_i32_0 = arith.constant 0 : i32
    return %arg0, %c0_i32 : i32, i32
  }
}

</mosaic_0001>

<bundles_post_ra>
// kernel: tpu_custom_call.1
= control target key start
LH: loop header
LB: loop body
LE: loop exit
PB: predicated region body
PF: predicated region fallthrough
CT: control target
= control target key end

     0   :  { %7 = vsyncpa [#allocation3], 0  ;;  %s257_s0 = inlined_call_operand.hbm [shape: f32[16,128], index: 0, kind: input, shape index: {}]   ;;  %s258_s1 = inlined_call_operand.hbm [shape: f32[16,128], index: 1, kind: input, shape index: {}]   ;;  %s259_s2 = inlined_call_operand.hbm [shape: f32[8,128], index: 2, kind: output, shape index: {}]  }
   0x1   :  { %8 = vsyncpa [#allocation6], 0 }
   0x2   :  { %9 = vsyncpa [#allocation4], 0  ;;  %s201_s9 = smov [#allocation2]   ;;  %s129_s13 = scalar_lea.hbm %s257_s0, 256 }
   0x3   :  { %s19_s10 = sshll.u32 %s201_s9, 4  ;;  %p130_p0 = scmp.ne.s32.totalorder %s257_s0, %s129_s13  ;;  %s20_s10 = int_to_ptr.vmem [resolvable:$true] %s19_s10 }
   0x4   :  { %p133_p1 = scmp.lt.u32.totalorder %s129_s13, %s257_s0 }
   0x6   :  { %p135_p2 = pnand %p133_p1, %p130_p0 }
   0x8   :  { %138 = shalt.err (!%p135_p2)
}
   0x9   :  { %s139_s18 = scalar_lea.vmem %s20_s10, 256  ;;  %p144_p4 = scmp.lt.s32.totalorder %s20_s10, %s20_s10 }
   0xa   :  { %p140_p3 = scmp.ne.s32.totalorder %s20_s10, %s139_s18  ;;  %p145_p5 = scmp.lt.s32.totalorder %s139_s18, %s139_s18 }
   0xc   :  { %p146_p6 = por %p145_p5, %p144_p4 }
   0xe   :  { %p147_p7 = pnand %p146_p6, %p140_p3 }
  0x10   :  { %150 = shalt.err (!%p147_p7)
}
  0x11   :  { %s202_s19 = smov 128   ;;  %s203_s20 = smov 8  }
  0x12   :  { %25 = dma.hbm_to_vmem [thread:$0]  %s257_s0, 256, %s20_s10, [#allocation3], %s202_s19, %s202_s19, %s203_s20  }
  0x13   :  { %s204_s23 = smov [#allocation5]   ;;  %s151_s27 = scalar_lea.hbm %s258_s1, 256 }
  0x14   :  { %s35_s24 = sshll.u32 %s204_s23, 4  ;;  %p152_p8 = scmp.ne.s32.totalorder %s258_s1, %s151_s27  ;;  %s36_s24 = int_to_ptr.vmem [resolvable:$true] %s35_s24 }
  0x15   :  { %p155_p9 = scmp.lt.u32.totalorder %s151_s27, %s258_s1 }
  0x17   :  { %p157_p10 = pnand %p155_p9, %p152_p8 }
  0x19   :  { %160 = shalt.err (!%p157_p10)
}
  0x1a   :  { %s161_s4 = scalar_lea.vmem %s36_s24, 256  ;;  %p166_p12 = scmp.lt.s32.totalorder %s36_s24, %s36_s24 }
  0x1b   :  { %p162_p11 = scmp.ne.s32.totalorder %s36_s24, %s161_s4  ;;  %p167_p13 = scmp.lt.s32.totalorder %s161_s4, %s161_s4 }
  0x1d   :  { %p168_p0 = por %p167_p13, %p166_p12 }
  0x1f   :  { %p169_p1 = pnand %p168_p0, %p162_p11 }
  0x21   :  { %172 = shalt.err (!%p169_p1)
}
  0x22   :  { %41 = dma.hbm_to_vmem [thread:$0]  %s258_s1, 256, %s36_s24, [#allocation6], %s202_s19, %s202_s19, %s203_s20  }
  0x23   :  { %195 = dma.done.wait [#allocation3], 256  }
  0x24   :  { %196 = vsyncadd [#allocation3], 4294967040 }
  0x25   :  { %197 = dma.done.wait [#allocation6], 256  }
  0x26   :  { %198 = vsyncadd [#allocation6], 4294967040  ;;  %v57_v0 = vld [vmem:[#allocation2] sm:$0xff]  ;;  %v58_v1 = vld [vmem:[#allocation2 + $0x8] sm:$0xff]  ;;  %s205_s1 = smov [#allocation7]  }
  0x27   :  { %v67_v2 = vand.u32 2147483647, %v57_v0  ;;  %v68_v3 = vand.u32 2147483647, %v58_v1  ;;  %v59_v14 = vld [vmem:[#allocation5] sm:$0xff]  ;;  %v60_v15 = vld [vmem:[#allocation5 + $0x8] sm:$0xff] }
  0x28   :  { %v61_v17 = vmax.f32 %v57_v0, 0.0  ;;  %v63_v18 = vmul.f32 %v59_v14, %v57_v0  ;;  %v62_v21 = vmax.f32 %v58_v1, 0.0  ;;  %v64_v22 = vmul.f32 %v60_v15, %v58_v1  ;;  %s105_s6 = sshll.u32 %s205_s1, 4  ;;  %s106_s6 = int_to_ptr.vmem [resolvable:$true] %s105_s6 }
  0x29   :  { %v69_v4 = vsub.f32 0.0, %v67_v2  ;;  %v70_v5 = vsub.f32 0.0, %v68_v3  ;;  %s173_s7 = scalar_lea.vmem %s106_s6, 128  ;;  %p178_p3 = scmp.lt.s32.totalorder %s106_s6, %s106_s6 }
  0x2a   :  { %v65_v26 = vsub.f32 %v61_v17, %v63_v18  ;;  %v66_v29 = vsub.f32 %v62_v21, %v64_v22  ;;  %p174_p2 = scmp.ne.s32.totalorder %s106_s6, %s173_s7  ;;  %p179_p4 = scmp.lt.s32.totalorder %s173_s7, %s173_s7 }
  0x2b   :  { %v71_v6 = vmul.f32 1.442695, %v69_v4  ;;  %v73_v7 = vmul.f32 1.442695, %v70_v5 }
  0x2c   :  { %p180_p5 = por %p179_p4, %p178_p3 }
  0x2d   :  { %121 = vpow2.f32 %v71_v6 }
  0x2e   :  { %123 = vpow2.f32 %v73_v7  ;;  %p181_p6 = pnand %p180_p5, %p174_p2 }
  0x37   :  { %v122_v8 = vpop.eup %121 }
  0x38   :  { %v124_v9 = vpop.eup %123  ;;  %v75_v10 = vadd.f32 1.0, %v122_v8  ;;  %v78_v12 = vmul.f32 -0.5, %v122_v8  ;;  %v81_v19 = vand.u32 2147483647, %v122_v8 }
  0x39   :  { %v84_v11 = vadd.f32 1.0, %v124_v9  ;;  %v87_v13 = vmul.f32 -0.5, %v124_v9  ;;  %v90_v23 = vand.u32 2147483647, %v124_v9 }
  0x3a   :  { %125 = vlog2.f32 %v75_v10  ;;  %v79_v16 = vadd.f32 1.0, %v78_v12  ;;  %vm82_vm0 = vcmp.lt.f32.partialorder %v81_v19, 0.0004427343 }
  0x3b   :  { %127 = vlog2.f32 %v84_v11  ;;  %v88_v20 = vadd.f32 1.0, %v87_v13  ;;  %vm91_vm1 = vcmp.lt.f32.partialorder %v90_v23, 0.0004427343 }
  0x3c   :  { %v80_v24 = vmul.f32 %v122_v8, %v79_v16 }
  0x3d   :  { %v89_v27 = vmul.f32 %v124_v9, %v88_v20 }
  0x44   :  { %v126_v25 = vpop.eup %125 }
  0x45   :  { %v128_v28 = vpop.eup %127  ;;  %v77_v30 = vmul.f32 0.6931472, %v126_v25 }
  0x46   :  { %v86_v31 = vmul.f32 0.6931472, %v128_v28 }
  0x47   :  { %v83_v32 = vsel %vm82_vm0, %v80_v24, %v77_v30 }
  0x48   :  { %v92_v33 = vsel %vm91_vm1, %v89_v27, %v86_v31  ;;  %v93_v34 = vadd.f32 %v83_v32, %v65_v26 }
  0x49   :  { %v94_v35 = vadd.f32 %v92_v33, %v66_v29 }
  0x4b   :  { %v96_v36 = vadd.f32 %v94_v35, %v93_v34 }
  0x4d   :  { %98 = vst [vmem:[#allocation7] sm:$0xff] %v96_v36 }
  0x4e   :  { %184 = shalt.err (!%p181_p6)
}
  0x4f   :  { %s185_s10 = scalar_lea.hbm %s259_s2, 128 }
  0x50   :  { %p186_p7 = scmp.ne.s32.totalorder %s259_s2, %s185_s10  ;;  %p189_p8 = scmp.lt.u32.totalorder %s185_s10, %s259_s2 }
  0x52   :  { %p191_p9 = pnand %p189_p8, %p186_p7 }
  0x54   :  { %194 = shalt.err (!%p191_p9)
}
  0x55   :  { %108 = dma.vmem_to_hbm [thread:$0]  %s106_s6, 128, %s259_s2, [#allocation4]  }
  0x56   :  { %199 = dma.done.wait [#allocation4], 128  }
  0x57   :  { %200 = vsyncadd [#allocation4], 4294967168 }
  0x58   :  { %112 = vsyncpa [#allocation3], 1 }
  0x59   :  { %113 = vsyncpa [#allocation6], 1 }
  0x5a   :  { %114 = vsyncpa [#allocation4], 1 }

</bundles_post_ra>
